<compile_context>
chip_gen: v6e
topology: v6e:2x2x1
jax: 0.10.0
libtpu: 0.0.40
codegen_flags: <defaults>
</compile_context>

<pallas_src>
import jax
import jax.numpy as jnp
from jax.experimental import pallas as pl
from jax.experimental.pallas import tpu as pltpu

EPS = 1e-5  # PyTorch BatchNorm2d default eps


def _round_up(x, m):
    return (x + m - 1) // m * m


# ----------------------------- Pallas kernels ------------------------------

def _conv3x3_stats_kernel(p_ref, w_ref, y_ref, s_ref, ss_ref):
    """One M-tile of the 3x3 conv as a single (tm, K)@(K, Cout) matmul.

    Also emits per-tile per-channel partial sums and sums-of-squares for the
    training-mode BatchNorm statistics (single-pass: E[x], E[x^2]).
    """
    y = jnp.dot(p_ref[...], w_ref[...], preferred_element_type=jnp.float32)
    y_ref[...] = y
    s_ref[...] = jnp.sum(y, axis=0, keepdims=True).reshape(s_ref.shape)
    ss_ref[...] = jnp.sum(y * y, axis=0, keepdims=True).reshape(ss_ref.shape)


def _bn_relu_kernel(y_ref, scale_ref, shift_ref, o_ref):
    """Fused BN affine (precomputed per-channel scale/shift) + ReLU, per M-tile."""
    o_ref[...] = jnp.maximum(y_ref[...] * scale_ref[...] + shift_ref[...], 0.0)


# ----------------------------- forward pass --------------------------------

def single_conv_forward(params, x_nchw, *, tile_m=256):
    """single_conv forward: Conv2d(3x3,pad=1) + BatchNorm2d (batch stats) + ReLU.

    x_nchw: (N, Cin, H, W) float32. Returns (N, Cout, H, W) float32.
    """
    w = params["w"]          # (Cout, Cin, 3, 3), PyTorch layout
    gamma = params["gamma"]  # (Cout,)
    beta = params["beta"]    # (Cout,)
    # params["b"] (conv bias) is mathematically cancelled by the training-mode BN
    # mean subtraction, so it is deliberately not applied (zero numerical change).

    N, Cin, H, W = x_nchw.shape
    Cout = w.shape[0]
    M = N * H * W
    K = 9 * Cin

    # ---- glue: NCHW -> NHWC, zero-pad, contiguous (M, 9*Cin) im2col, bf16 ----
    x = jnp.transpose(x_nchw, (0, 2, 3, 1))
    xp = jnp.pad(x, ((0, 0), (1, 1), (1, 1), (0, 0)))
    taps = [xp[:, dy:dy + H, dx:dx + W, :] for dy in range(3) for dx in range(3)]
    patches = jnp.concatenate(taps, axis=-1).reshape(M, K)

    tm = min(tile_m, _round_up(M, 8))
    M_pad = _round_up(M, tm)
    if M_pad != M:
        # Zero rows contribute 0 to both sum and sum-of-squares -> stats stay exact
        # (divided by the true M below).
        patches = jnp.pad(patches, ((0, M_pad - M), (0, 0)))
    m_tiles = M_pad // tm

    patches = patches.astype(jnp.bfloat16)
    # (tap_y, tap_x, Cin, Cout) flattened to (9*Cin, Cout) matches the im2col K order.
    w_mat = jnp.transpose(w, (2, 3, 1, 0)).reshape(K, Cout).astype(jnp.bfloat16)

    # ---- kernel 1: tiled conv matmul + per-tile partial BN statistics ----
    y, s_part, ss_part = pl.pallas_call(
        _conv3x3_stats_kernel,
        out_shape=(
            jax.ShapeDtypeStruct((M_pad, Cout), jnp.float32),
            jax.ShapeDtypeStruct((m_tiles, 1, Cout), jnp.float32),
            jax.ShapeDtypeStruct((m_tiles, 1, Cout), jnp.float32),
        ),
        grid_spec=pltpu.PrefetchScalarGridSpec(
            num_scalar_prefetch=0,
            grid=(m_tiles,),
            in_specs=[
                pl.BlockSpec((tm, K), lambda i: (i, 0)),
                pl.BlockSpec((K, Cout), lambda i: (0, 0)),   # weights stay resident
            ],
            out_specs=(
                pl.BlockSpec((tm, Cout), lambda i: (i, 0)),
                pl.BlockSpec((1, 1, Cout), lambda i: (i, 0, 0)),
                pl.BlockSpec((1, 1, Cout), lambda i: (i, 0, 0)),
            ),
        ),
        compiler_params=pltpu.CompilerParams(dimension_semantics=("parallel",)),
    )(patches, w_mat)

    # ---- glue: global batch statistics (biased variance) -> per-channel affine ----
    total_s = jnp.sum(s_part[:, 0, :], axis=0)
    total_ss = jnp.sum(ss_part[:, 0, :], axis=0)
    mean = total_s / M
    var = jnp.maximum(total_ss / M - mean * mean, 0.0)
    inv_std = jax.lax.rsqrt(var + EPS)
    scale = (gamma * inv_std).reshape(1, Cout)
    shift = (beta - mean * gamma * inv_std).reshape(1, Cout)

    # ---- kernel 2: tiled BN affine + ReLU ----
    out = pl.pallas_call(
        _bn_relu_kernel,
        out_shape=jax.ShapeDtypeStruct((M_pad, Cout), jnp.float32),
        grid_spec=pltpu.PrefetchScalarGridSpec(
            num_scalar_prefetch=0,
            grid=(m_tiles,),
            in_specs=[
                pl.BlockSpec((tm, Cout), lambda i: (i, 0)),
                pl.BlockSpec((1, Cout), lambda i: (0, 0)),
                pl.BlockSpec((1, Cout), lambda i: (0, 0)),
            ],
            out_specs=pl.BlockSpec((tm, Cout), lambda i: (i, 0)),
        ),
        compiler_params=pltpu.CompilerParams(dimension_semantics=("parallel",)),
    )(y, scale, shift)

    out = out[:M].reshape(N, H, W, Cout)
    return jnp.transpose(out, (0, 3, 1, 2))                  # NHWC -> NCHW


# ----------------------------- reference (pure JAX) -------------------------

def single_conv_reference(params, x_nchw):
    w, b = params["w"], params["b"]
    gamma, beta = params["gamma"], params["beta"]
    y = jax.lax.conv_general_dilated(
        x_nchw, w, window_strides=(1, 1), padding=((1, 1), (1, 1)),
        dimension_numbers=("NCHW", "OIHW", "NCHW"))
    y = y + b.reshape(1, -1, 1, 1)
    mean = jnp.mean(y, axis=(0, 2, 3), keepdims=True)
    var = jnp.mean((y - mean) ** 2, axis=(0, 2, 3), keepdims=True)
    yhat = (y - mean) * jax.lax.rsqrt(var + EPS)
    return jnp.maximum(gamma.reshape(1, -1, 1, 1) * yhat + beta.reshape(1, -1, 1, 1),
                       0.0)


# ----------------------------- parameter init ------------------------------

def init_single_conv_params(key, cin, cout):
    # PyTorch Conv2d default init: U(-1/sqrt(fan_in), 1/sqrt(fan_in)); BN: gamma=1, beta=0.
    wkey, bkey = jax.random.split(key)
    bound = 1.0 / jnp.sqrt(jnp.float32(cin * 9))
    w = jax.random.uniform(wkey, (cout, cin, 3, 3), jnp.float32, -bound, bound)
    b = jax.random.uniform(bkey, (cout,), jnp.float32, -bound, bound)
    return {"w": w, "b": b,
            "gamma": jnp.ones((cout,), jnp.float32),
            "beta": jnp.zeros((cout,), jnp.float32)}


# --------------------------------- main -------------------------------------

if __name__ == "__main__":
    key = jax.random.PRNGKey(0)
    pkey, xkey = jax.random.split(key)

    N, CIN, COUT, H, W = 2, 4, 32, 16, 16
    params = init_single_conv_params(pkey, CIN, COUT)
    x = jax.random.normal(xkey, (N, CIN, H, W), jnp.float32)

    fwd = jax.jit(single_conv_forward)
    out = fwd(params, x)
    jax.block_until_ready(out)

    assert out.shape == (N, COUT, H, W), out.shape
    assert bool(jnp.all(jnp.isfinite(out)))

    # Correctness check against a pure-JAX f32 reference (bf16 matmul -> loose tol).
    ref = single_conv_reference(params, x)
    max_err = float(jnp.max(jnp.abs(out - ref)))
    assert max_err < 1e-1, f"max abs error too large: {max_err}"

    print("KERNEL_OK")
</pallas_src>

<mosaic_0001>
module attributes {stable_mosaic.version = 11 : i64} {
  func.func @_conv3x3_stats_kernel(%arg0: i32, %arg1: memref<256x36xbf16, #tpu.memory_space<vmem>>, %arg2: memref<36x32xbf16, #tpu.memory_space<vmem>>, %arg3: memref<256x32xf32, #tpu.memory_space<vmem>>, %arg4: memref<1x1x32xf32, #tpu.memory_space<vmem>>, %arg5: memref<1x1x32xf32, #tpu.memory_space<vmem>>) attributes {dimension_semantics = [#tpu.dimension_semantics<parallel>], iteration_bounds = array<i64: 2>, scalar_prefetch = 0 : i64, scratch_operands = 0 : i64, tpu.core_type = #tpu.core_type<tc>, window_params = [{transform_indices = @transform_0, window_bounds = array<i64: 256, 36>}, {pipeline_mode = #tpu.pipeline_mode<synchronous>, transform_indices = @transform_1, window_bounds = array<i64: 36, 32>}, {transform_indices = @transform_2, window_bounds = array<i64: 256, 32>}, {transform_indices = @transform_3, window_bounds = array<i64: 1, 1, 32>}, {transform_indices = @transform_4, window_bounds = array<i64: 1, 1, 32>}]} {
    %c0 = arith.constant 0 : index
    %c0_0 = arith.constant 0 : index
    %0 = vector.load %arg1[%c0, %c0_0] : memref<256x36xbf16, #tpu.memory_space<vmem>>, vector<256x36xbf16>
    %c0_1 = arith.constant 0 : index
    %c0_2 = arith.constant 0 : index
    %1 = vector.load %arg2[%c0_1, %c0_2] : memref<36x32xbf16, #tpu.memory_space<vmem>>, vector<36x32xbf16>
    %cst = arith.constant dense<0.000000e+00> : vector<256x32xf32>
    %2 = tpu.matmul %0, %1, %cst {dimension_numbers = #tpu.dot_dimension_numbers<[1], [0], [0], [1], [0, 0, 1, 1], [], []>} : vector<256x36xbf16>, vector<36x32xbf16>, vector<256x32xf32> -> vector<256x32xf32>
    %c0_3 = arith.constant 0 : index
    %c0_4 = arith.constant 0 : index
    %3 = vector.load %arg3[%c0_3, %c0_4] : memref<256x32xf32, #tpu.memory_space<vmem>>, vector<256x32xf32>
    tpu.vector_store %arg3[%c0_3, %c0_4], %2 {strides = array<i32>} : memref<256x32xf32, #tpu.memory_space<vmem>>, vector<256x32xf32>,
    %cst_5 = arith.constant dense<0.000000e+00> : vector<32xf32>
    %4 = vector.multi_reduction <add>, %2, %cst_5 [0] : vector<256x32xf32> to vector<32xf32>
    %5 = vector.shape_cast %4 : vector<32xf32> to vector<1x32xf32>
    %6 = vector.shape_cast %5 : vector<1x32xf32> to vector<1x1x32xf32>
    %c0_6 = arith.constant 0 : index
    %c0_7 = arith.constant 0 : index
    %c0_8 = arith.constant 0 : index
    %7 = vector.load %arg4[%c0_6, %c0_7, %c0_8] : memref<1x1x32xf32, #tpu.memory_space<vmem>>, vector<1x1x32xf32>
    tpu.vector_store %arg4[%c0_6, %c0_7, %c0_8], %6 {strides = array<i32>} : memref<1x1x32xf32, #tpu.memory_space<vmem>>, vector<1x1x32xf32>,
    %8 = arith.mulf %2, %2 : vector<256x32xf32>
    %cst_9 = arith.constant dense<0.000000e+00> : vector<32xf32>
    %9 = vector.multi_reduction <add>, %8, %cst_9 [0] : vector<256x32xf32> to vector<32xf32>
    %10 = vector.shape_cast %9 : vector<32xf32> to vector<1x32xf32>
    %11 = vector.shape_cast %10 : vector<1x32xf32> to vector<1x1x32xf32>
    %c0_10 = arith.constant 0 : index
    %c0_11 = arith.constant 0 : index
    %c0_12 = arith.constant 0 : index
    %12 = vector.load %arg5[%c0_10, %c0_11, %c0_12] : memref<1x1x32xf32, #tpu.memory_space<vmem>>, vector<1x1x32xf32>
    tpu.vector_store %arg5[%c0_10, %c0_11, %c0_12], %11 {strides = array<i32>} : memref<1x1x32xf32, #tpu.memory_space<vmem>>, vector<1x1x32xf32>,
    return
  }
  func.func @transform_0(%arg0: i32) -> (i32, i32) {
    %c0_i32 = arith.constant 0 : i32
    %c0_i32_0 = arith.constant 0 : i32
    return %arg0, %c0_i32 : i32, i32
  }
  func.func @transform_1(%arg0: i32) -> (i32, i32) {
    %c0_i32 = arith.constant 0 : i32
    %c0_i32_0 = arith.constant 0 : i32
    %c0_i32_1 = arith.constant 0 : i32
    return %c0_i32, %c0_i32_0 : i32, i32
  }
  func.func @transform_2(%arg0: i32) -> (i32, i32) {
    %c0_i32 = arith.constant 0 : i32
    %c0_i32_0 = arith.constant 0 : i32
    return %arg0, %c0_i32 : i32, i32
  }
  func.func @transform_3(%arg0: i32) -> (i32, i32, i32) {
    %c0_i32 = arith.constant 0 : i32
    %c0_i32_0 = arith.constant 0 : i32
    %c0_i32_1 = arith.constant 0 : i32
    return %arg0, %c0_i32, %c0_i32_0 : i32, i32, i32
  }
  func.func @transform_4(%arg0: i32) -> (i32, i32, i32) {
    %c0_i32 = arith.constant 0 : i32
    %c0_i32_0 = arith.constant 0 : i32
    %c0_i32_1 = arith.constant 0 : i32
    return %arg0, %c0_i32, %c0_i32_0 : i32, i32, i32
  }
}

module attributes {stable_mosaic.version = 11 : i64} {
  func.func @_bn_relu_kernel(%arg0: i32, %arg1: memref<256x32xf32, #tpu.memory_space<vmem>>, %arg2: memref<1x32xf32, #tpu.memory_space<vmem>>, %arg3: memref<1x32xf32, #tpu.memory_space<vmem>>, %arg4: memref<256x32xf32, #tpu.memory_space<vmem>>) attributes {dimension_semantics = [#tpu.dimension_semantics<parallel>], iteration_bounds = array<i64: 2>, scalar_prefetch = 0 : i64, scratch_operands = 0 : i64, tpu.core_type = #tpu.core_type<tc>, window_params = [{transform_indices = @transform_0, window_bounds = array<i64: 256, 32>}, {pipeline_mode = #tpu.pipeline_mode<synchronous>, transform_indices = @transform_1, window_bounds = array<i64: 1, 32>}, {pipeline_mode = #tpu.pipeline_mode<synchronous>, transform_indices = @transform_2, window_bounds = array<i64: 1, 32>}, {transform_indices = @transform_3, window_bounds = array<i64: 256, 32>}]} {
    %c0 = arith.constant 0 : index
    %c0_0 = arith.constant 0 : index
    %0 = vector.load %arg1[%c0, %c0_0] : memref<256x32xf32, #tpu.memory_space<vmem>>, vector<256x32xf32>
    %c0_1 = arith.constant 0 : index
    %c0_2 = arith.constant 0 : index
    %1 = vector.load %arg2[%c0_1, %c0_2] : memref<1x32xf32, #tpu.memory_space<vmem>>, vector<1x32xf32>
    %2 = vector.broadcast %1 : vector<1x32xf32> to vector<256x32xf32>
    %3 = arith.mulf %0, %2 : vector<256x32xf32>
    %c0_3 = arith.constant 0 : index
    %c0_4 = arith.constant 0 : index
    %4 = vector.load %arg3[%c0_3, %c0_4] : memref<1x32xf32, #tpu.memory_space<vmem>>, vector<1x32xf32>
    %5 = vector.broadcast %4 : vector<1x32xf32> to vector<256x32xf32>
    %6 = arith.addf %3, %5 : vector<256x32xf32>
    %cst = arith.constant 0.000000e+00 : f32
    %7 = vector.broadcast %cst : f32 to vector<256x32xf32>
    %8 = arith.maximumf %6, %7 : vector<256x32xf32>
    %c0_5 = arith.constant 0 : index
    %c0_6 = arith.constant 0 : index
    %9 = vector.load %arg4[%c0_5, %c0_6] : memref<256x32xf32, #tpu.memory_space<vmem>>, vector<256x32xf32>
    tpu.vector_store %arg4[%c0_5, %c0_6], %8 {strides = array<i32>} : memref<256x32xf32, #tpu.memory_space<vmem>>, vector<256x32xf32>,
    return
  }
  func.func @transform_0(%arg0: i32) -> (i32, i32) {
    %c0_i32 = arith.constant 0 : i32
    %c0_i32_0 = arith.constant 0 : i32
    return %arg0, %c0_i32 : i32, i32
  }
  func.func @transform_1(%arg0: i32) -> (i32, i32) {
    %c0_i32 = arith.constant 0 : i32
    %c0_i32_0 = arith.constant 0 : i32
    %c0_i32_1 = arith.constant 0 : i32
    return %c0_i32, %c0_i32_0 : i32, i32
  }
  func.func @transform_2(%arg0: i32) -> (i32, i32) {
    %c0_i32 = arith.constant 0 : i32
    %c0_i32_0 = arith.constant 0 : i32
    %c0_i32_1 = arith.constant 0 : i32
    return %c0_i32, %c0_i32_0 : i32, i32
  }
  func.func @transform_3(%arg0: i32) -> (i32, i32) {
    %c0_i32 = arith.constant 0 : i32
    %c0_i32_0 = arith.constant 0 : i32
    return %arg0, %c0_i32 : i32, i32
  }
}

</mosaic_0001>

<bundles_post_ra>
// kernel: single_conv_forward.3
= control target key start
LH: loop header
LB: loop body
LE: loop exit
PB: predicated region body
PF: predicated region fallthrough
CT: control target
= control target key end

     0   :  { %8 = vsyncpa [#allocation3], 0  ;;  %s847_s0 = inlined_call_operand.vmem [shape: f32[512,32], index: 0, kind: input, shape index: {}]   ;;  %s848_s1 = inlined_call_operand.vmem [shape: f32[1,32], index: 1, kind: input, shape index: {}]   ;;  %s849_s2 = inlined_call_operand.vmem [shape: f32[1,32], index: 2, kind: input, shape index: {}]   ;;  %s850_s3 = inlined_call_operand.hbm [shape: f32[512,32], index: 3, kind: output, shape index: {}]  }
   0x1   :  { %10 = vsyncpa [#allocation3 + $0x1], 0  ;;  %s564_s12 = smov 0   ;;  %s566_s13 = smov 0  }
   0x2   :  { %s568_s14 = smov 0   ;;  %s570_s15 = smov 0  }
   0x3 LB: > { %s585_s16 = sadd.s32 4294967295, %s539_s15   ;;  %s423_s17 = sadd.s32 4294967294, %s539_s15   ;;  %s539_s15 = sphi %s570_s15, %s856_s15   ;;  %s535_s14 = sphi %s568_s14, %s855_s14   ;;  %s531_s13 = sphi %s566_s13, %s854_s13   ;;  %s527_s12 = sphi %s564_s12, %s853_s12  }
   0x4   : > { %s589_s18 = sadd.s32 1, %s539_s15   ;;  %s91_s19 = sadd.s32 1, %s535_s14 }
   0x5   : > { %s88_s20 = ssub.s32 %s539_s15, %s589_s18  ;;  %p101_p0 = scmp.ne.s32.totalorder %s535_s14, %s531_s13 }
   0x6   : > { %p89_p1 = scmp.eq.s32.totalorder %s88_s20, 0  ;;  %p102_p2 = scmp.eq.s32.totalorder %s585_s16, 1 }
   0x7   : > { %p107_p3 = scmp.ne.s32.totalorder %s531_s13, %s527_s12  ;;  %p108_p4 = scmp.eq.s32.totalorder %s423_s17, 1 }
   0x8   : > { %s600_s21 = scalar_select %p89_p1, %s535_s14, %s91_s19  }
   0x9   : > { %p602_p5 = por %p102_p2, %p101_p0  ;;  %p606_p6 = por %p108_p4, %p107_p3 }
   0xa   : > { %p426_p7 = scmp.ge.s32.totalorder %s539_s15, 1  ;;  %p141_p8 = scmp.lt.s32.totalorder %s539_s15, 3 }
   0xc   : > { %p142_p9 = pnand %p426_p7, %p141_p8 }
   0xd   : > { %s428_s24 = sshll.u32 (!%p142_p9), %s585_s16, 5  ;;  %s162_s25 = sand.u32 (!%p142_p9), 1, %s531_s13  }
   0xe   : > { %145 = sbr.rel (%p142_p9) target bundleno = 65 (0x41), region = 32  ;;  %p166_p10 = scmp.lt.s32.totalorder (!%p142_p9), %s428_s24, 63 }
   0xf   : > { %s634_s7 = sshll.u32 (!%p142_p9), %s162_s25, 8  ;;  %s437_s9 = sshll.u32 (!%p142_p9), %s585_s16, 12 }
  0x10   : > { %s665_s8 = scalar_lea.vmem (!%p142_p9), [#allocation2], %s634_s7  ;;  %s791_s17 = scalar_lea.hbm (!%p142_p9), %s850_s3, %s437_s9 }
  0x11   : > { %s361_s10 = sshll.u32 (!%p142_p9), %s665_s8, 4  ;;  %s807_s19 = scalar_lea.sflag (!%p142_p9), [#allocation3], %s162_s25  ;;  %s793_s10 = int_to_ptr.vmem [resolvable:$true] %s361_s10 }
  0x12   : > { %s479_s20 = scalar_lea.vmem (!%p142_p9), %s793_s10, 4096 }
  0x13   : > { %s858_s24 = smov (!%p166_p10, %s428_s24), 63  ;;  %v617_v0 = vld [vmem:[%s848_s1] ss:$0 sm:$0xff]  ;;  %vm314_vm0 = vcmask 261120   ;;  %p480_p11 = scmp.ne.s32.totalorder %s793_s10, %s479_s20 }
  0x14   : > { %s429_s26 = sshll.u32 %s858_s24, 3  ;;  %v627_v1 = vld [vmem:[%s849_s2] ss:$0 sm:$0xff]  ;;  %s541_s24 = smov [#allocation2]  }
  0x15   : > { %s622_s4 = scalar_lea.vmem %s847_s0, %s429_s26  ;;  %p481_p12 = pnand %p480_p11, %p602_p5 }
  0x16   : > { %v172_v2 = vld [vmem:[%s622_s4] sm:$0xff]  ;;  %v173_v3 = vld [vmem:[%s622_s4 + $0x8] sm:$0xff]  ;;  %v174_v4 = vld [vmem:[%s622_s4 + $0x10] sm:$0xff]  ;;  %s483_s26 = sshll.u32 %s541_s24, 4  ;;  %s484_s26 = int_to_ptr.vmem [resolvable:$false] %s483_s26 }
  0x17   : > { %v211_v5 = vmul.f32 %v617_v0, %v172_v2  ;;  %v212_v6 = vmul.f32 %v617_v0, %v173_v3  ;;  %v213_v7 = vmul.f32 %v617_v0, %v174_v4  ;;  %v175_v8 = vld [vmem:[%s622_s4 + $0x18] sm:$0xff]  ;;  %v176_v9 = vld [vmem:[%s622_s4 + $0x20] sm:$0xff]  ;;  %v177_v10 = vld [vmem:[%s622_s4 + $0x28] sm:$0xff]  ;;  %p482_p13 = pneg %p481_p12  ;;  %s485_s27 = scalar_lea.vmem %s484_s26, 8192 }
  0x18   : > { %v214_v11 = vmul.f32 %v617_v0, %v175_v8  ;;  %v215_v12 = vmul.f32 %v617_v0, %v176_v9  ;;  %v216_v13 = vmul.f32 %v617_v0, %v177_v10  ;;  %v178_v14 = vld [vmem:[%s622_s4 + $0x30] sm:$0xff]  ;;  %v179_v15 = vld [vmem:[%s622_s4 + $0x38] sm:$0xff]  ;;  %v180_v24 = vld [vmem:[%s622_s4 + $0x40] sm:$0xff]  ;;  %p486_p0 = scmp.lt.s32.totalorder %s793_s10, %s484_s26  ;;  %p487_p1 = scmp.lt.s32.totalorder %s485_s27, %s479_s20 }
  0x19   : > { %v250_v16 = vadd.f32 %v627_v1, %v211_v5  ;;  %v251_v17 = vadd.f32 %v627_v1, %v212_v6  ;;  %v252_v18 = vadd.f32 %v627_v1, %v213_v7  ;;  %v217_v19 = vmul.f32 %v617_v0, %v178_v14  ;;  %v181_v25 = vld [vmem:[%s622_s4 + $0x48] sm:$0xff]  ;;  %v182_v26 = vld [vmem:[%s622_s4 + $0x50] sm:$0xff]  ;;  %v183_v31 = vld [vmem:[%s622_s4 + $0x58] sm:$0xff] }
  0x1a   : > { %v253_v20 = vadd.f32 %v627_v1, %v214_v11  ;;  %v254_v21 = vadd.f32 %v627_v1, %v215_v12  ;;  %v255_v22 = vadd.f32 %v627_v1, %v216_v13  ;;  %v218_v23 = vmul.f32 %v617_v0, %v179_v15  ;;  %v184_v32 = vld [vmem:[%s622_s4 + $0x60] sm:$0xff]  ;;  %v185_v33 = vld [vmem:[%s622_s4 + $0x68] sm:$0xff]  ;;  %v186_v38 = vld [vmem:[%s622_s4 + $0x70] sm:$0xff]  ;;  %p488_p2 = por %p487_p1, %p486_p0 }
  0x1b   : > { %v282_v27 = vmax.f32 %v250_v16, 0.0  ;;  %v283_v28 = vmax.f32 %v251_v17, 0.0  ;;  %v284_v29 = vmax.f32 %v252_v18, 0.0  ;;  %v256_v30 = vadd.f32 %v627_v1, %v217_v19  ;;  %v187_v43 = vld [vmem:[%s622_s4 + $0x78] sm:$0xff]  ;;  %v188_v56 = vld [vmem:[%s622_s4 + $0x80] sm:$0xff]  ;;  %v189_v57 = vld [vmem:[%s622_s4 + $0x88] sm:$0xff] }
  0x1c   : > { %v285_v34 = vmax.f32 %v253_v20, 0.0  ;;  %v286_v35 = vmax.f32 %v254_v21, 0.0  ;;  %v287_v36 = vmax.f32 %v255_v22, 0.0  ;;  %v257_v37 = vadd.f32 %v627_v1, %v218_v23  ;;  %v190_v58 = vld [vmem:[%s622_s4 + $0x90] sm:$0xff]  ;;  %v191_v63 = vld [vmem:[%s622_s4 + $0x98] sm:$0xff]  ;;  %v192_v2 = vld [vmem:[%s622_s4 + $0xa0] sm:$0xff]  ;;  %p489_p3 = pnand %p488_p2, %p482_p13 }
  0x1d   : > { %315 = vst.msk [vmem:[%s665_s8] sm:$0xff] %vm314_vm0, %v282_v27  ;;  %316 = vst.msk [vmem:[%s665_s8 + $0x8] sm:$0xff] %vm314_vm0, %v283_v28  ;;  %v288_v39 = vmax.f32 %v256_v30, 0.0  ;;  %v219_v40 = vmul.f32 %v617_v0, %v180_v24  ;;  %v220_v41 = vmul.f32 %v617_v0, %v181_v25  ;;  %v221_v42 = vmul.f32 %v617_v0, %v182_v26  ;;  %v193_v3 = vld [vmem:[%s622_s4 + $0xa8] sm:$0xff]  ;;  %v194_v8 = vld [vmem:[%s622_s4 + $0xb0] sm:$0xff] }
  0x1e   : > { %317 = vst.msk [vmem:[%s665_s8 + $0x10] sm:$0xff] %vm314_vm0, %v284_v29  ;;  %318 = vst.msk [vmem:[%s665_s8 + $0x18] sm:$0xff] %vm314_vm0, %v285_v34  ;;  %v289_v44 = vmax.f32 %v257_v37, 0.0  ;;  %v222_v45 = vmul.f32 %v617_v0, %v183_v31  ;;  %v223_v46 = vmul.f32 %v617_v0, %v184_v32  ;;  %v224_v47 = vmul.f32 %v617_v0, %v185_v33  ;;  %v195_v13 = vld [vmem:[%s622_s4 + $0xb8] sm:$0xff]  ;;  %v196_v26 = vld [vmem:[%s622_s4 + $0xc0] sm:$0xff] }
  0x1f   : > { %319 = vst.msk [vmem:[%s665_s8 + $0x20] sm:$0xff] %vm314_vm0, %v286_v35  ;;  %320 = vst.msk [vmem:[%s665_s8 + $0x28] sm:$0xff] %vm314_vm0, %v287_v36  ;;  %v258_v48 = vadd.f32 %v627_v1, %v219_v40  ;;  %v259_v49 = vadd.f32 %v627_v1, %v220_v41  ;;  %v260_v50 = vadd.f32 %v627_v1, %v221_v42  ;;  %v197_v27 = vld [vmem:[%s622_s4 + $0xc8] sm:$0xff]  ;;  %v198_v28 = vld [vmem:[%s622_s4 + $0xd0] sm:$0xff] }
  0x20   : > { %321 = vst.msk [vmem:[%s665_s8 + $0x30] sm:$0xff] %vm314_vm0, %v288_v39  ;;  %v225_v51 = vmul.f32 %v617_v0, %v186_v38  ;;  %322 = vst.msk [vmem:[%s665_s8 + $0x38] sm:$0xff] %vm314_vm0, %v289_v44  ;;  %v261_v52 = vadd.f32 %v627_v1, %v222_v45  ;;  %v262_v53 = vadd.f32 %v627_v1, %v223_v46  ;;  %v199_v33 = vld [vmem:[%s622_s4 + $0xd8] sm:$0xff]  ;;  %v200_v34 = vld [vmem:[%s622_s4 + $0xe0] sm:$0xff] }
  0x21   : > { %v263_v54 = vadd.f32 %v627_v1, %v224_v47  ;;  %v226_v55 = vmul.f32 %v617_v0, %v187_v43  ;;  %v290_v59 = vmax.f32 %v258_v48, 0.0  ;;  %v291_v60 = vmax.f32 %v259_v49, 0.0  ;;  %v201_v35 = vld [vmem:[%s622_s4 + $0xe8] sm:$0xff]  ;;  %v202_v40 = vld [vmem:[%s622_s4 + $0xf0] sm:$0xff]  ;;  %v203_v45 = vld [vmem:[%s622_s4 + $0xf8] sm:$0xff] }
  0x22   : > { %v292_v61 = vmax.f32 %v260_v50, 0.0  ;;  %v264_v62 = vadd.f32 %v627_v1, %v225_v51  ;;  %v293_v4 = vmax.f32 %v261_v52, 0.0  ;;  %v294_v5 = vmax.f32 %v262_v53, 0.0 }
  0x23   : > { %v295_v6 = vmax.f32 %v263_v54, 0.0  ;;  %v265_v7 = vadd.f32 %v627_v1, %v226_v55  ;;  %323 = vst.msk [vmem:[%s665_s8 + $0x40] sm:$0xff] %vm314_vm0, %v290_v59  ;;  %324 = vst.msk [vmem:[%s665_s8 + $0x48] sm:$0xff] %vm314_vm0, %v291_v60  ;;  %v227_v10 = vmul.f32 %v617_v0, %v188_v56  ;;  %v228_v11 = vmul.f32 %v617_v0, %v189_v57 }
  0x24   : > { %325 = vst.msk [vmem:[%s665_s8 + $0x50] sm:$0xff] %vm314_vm0, %v292_v61  ;;  %v296_v9 = vmax.f32 %v264_v62, 0.0  ;;  %v229_v12 = vmul.f32 %v617_v0, %v190_v58  ;;  %326 = vst.msk [vmem:[%s665_s8 + $0x58] sm:$0xff] %vm314_vm0, %v293_v4  ;;  %v230_v15 = vmul.f32 %v617_v0, %v191_v63  ;;  %v231_v16 = vmul.f32 %v617_v0, %v192_v2 }
  0x25   : > { %327 = vst.msk [vmem:[%s665_s8 + $0x60] sm:$0xff] %vm314_vm0, %v294_v5  ;;  %328 = vst.msk [vmem:[%s665_s8 + $0x68] sm:$0xff] %vm314_vm0, %v295_v6  ;;  %v297_v14 = vmax.f32 %v265_v7, 0.0  ;;  %v232_v17 = vmul.f32 %v617_v0, %v193_v3  ;;  %v266_v18 = vadd.f32 %v627_v1, %v227_v10  ;;  %v267_v19 = vadd.f32 %v627_v1, %v228_v11 }
  0x26   : > { %329 = vst.msk [vmem:[%s665_s8 + $0x70] sm:$0xff] %vm314_vm0, %v296_v9  ;;  %v268_v20 = vadd.f32 %v627_v1, %v229_v12  ;;  %v233_v21 = vmul.f32 %v617_v0, %v194_v8  ;;  %v269_v22 = vadd.f32 %v627_v1, %v230_v15  ;;  %v270_v23 = vadd.f32 %v627_v1, %v231_v16 }
  0x27   : > { %330 = vst.msk [vmem:[%s665_s8 + $0x78] sm:$0xff] %vm314_vm0, %v297_v14  ;;  %v271_v24 = vadd.f32 %v627_v1, %v232_v17  ;;  %v234_v25 = vmul.f32 %v617_v0, %v195_v13  ;;  %v298_v29 = vmax.f32 %v266_v18, 0.0  ;;  %v299_v30 = vmax.f32 %v267_v19, 0.0 }
  0x28   : > { %v300_v31 = vmax.f32 %v268_v20, 0.0  ;;  %v272_v32 = vadd.f32 %v627_v1, %v233_v21  ;;  %v301_v36 = vmax.f32 %v269_v22, 0.0  ;;  %v302_v37 = vmax.f32 %v270_v23, 0.0 }
  0x29   : > { %v303_v38 = vmax.f32 %v271_v24, 0.0  ;;  %v273_v39 = vadd.f32 %v627_v1, %v234_v25  ;;  %331 = vst.msk [vmem:[%s665_s8 + $0x80] sm:$0xff] %vm314_vm0, %v298_v29  ;;  %332 = vst.msk [vmem:[%s665_s8 + $0x88] sm:$0xff] %vm314_vm0, %v299_v30  ;;  %v235_v42 = vmul.f32 %v617_v0, %v196_v26  ;;  %v236_v43 = vmul.f32 %v617_v0, %v197_v27 }
  0x2a   : > { %333 = vst.msk [vmem:[%s665_s8 + $0x90] sm:$0xff] %vm314_vm0, %v300_v31  ;;  %v304_v41 = vmax.f32 %v272_v32, 0.0  ;;  %v237_v44 = vmul.f32 %v617_v0, %v198_v28  ;;  %334 = vst.msk [vmem:[%s665_s8 + $0x98] sm:$0xff] %vm314_vm0, %v301_v36  ;;  %v238_v47 = vmul.f32 %v617_v0, %v199_v33  ;;  %v239_v48 = vmul.f32 %v617_v0, %v200_v34 }
  0x2b   : > { %335 = vst.msk [vmem:[%s665_s8 + $0xa0] sm:$0xff] %vm314_vm0, %v302_v37  ;;  %336 = vst.msk [vmem:[%s665_s8 + $0xa8] sm:$0xff] %vm314_vm0, %v303_v38  ;;  %v305_v46 = vmax.f32 %v273_v39, 0.0  ;;  %v240_v49 = vmul.f32 %v617_v0, %v201_v35  ;;  %v274_v50 = vadd.f32 %v627_v1, %v235_v42  ;;  %v275_v51 = vadd.f32 %v627_v1, %v236_v43 }
  0x2c   : > { %337 = vst.msk [vmem:[%s665_s8 + $0xb0] sm:$0xff] %vm314_vm0, %v304_v41  ;;  %v276_v52 = vadd.f32 %v627_v1, %v237_v44  ;;  %v241_v53 = vmul.f32 %v617_v0, %v202_v40  ;;  %v277_v54 = vadd.f32 %v627_v1, %v238_v47  ;;  %v278_v55 = vadd.f32 %v627_v1, %v239_v48 }
  0x2d   : > { %338 = vst.msk [vmem:[%s665_s8 + $0xb8] sm:$0xff] %vm314_vm0, %v305_v46  ;;  %v279_v56 = vadd.f32 %v627_v1, %v240_v49  ;;  %v242_v57 = vmul.f32 %v617_v0, %v203_v45  ;;  %v306_v58 = vmax.f32 %v274_v50, 0.0  ;;  %v307_v59 = vmax.f32 %v275_v51, 0.0 }
  0x2e   : > { %v308_v60 = vmax.f32 %v276_v52, 0.0  ;;  %v280_v61 = vadd.f32 %v627_v1, %v241_v53  ;;  %v309_v62 = vmax.f32 %v277_v54, 0.0  ;;  %v310_v63 = vmax.f32 %v278_v55, 0.0 }
  0x2f   : > { %v311_v2 = vmax.f32 %v279_v56, 0.0  ;;  %v281_v3 = vadd.f32 %v627_v1, %v242_v57  ;;  %339 = vst.msk [vmem:[%s665_s8 + $0xc0] sm:$0xff] %vm314_vm0, %v306_v58  ;;  %340 = vst.msk [vmem:[%s665_s8 + $0xc8] sm:$0xff] %vm314_vm0, %v307_v59 }
  0x30   : > { %341 = vst.msk [vmem:[%s665_s8 + $0xd0] sm:$0xff] %vm314_vm0, %v308_v60  ;;  %v312_v0 = vmax.f32 %v280_v61, 0.0  ;;  %342 = vst.msk [vmem:[%s665_s8 + $0xd8] sm:$0xff] %vm314_vm0, %v309_v62 }
  0x31   : > { %343 = vst.msk [vmem:[%s665_s8 + $0xe0] sm:$0xff] %vm314_vm0, %v310_v63  ;;  %344 = vst.msk [vmem:[%s665_s8 + $0xe8] sm:$0xff] %vm314_vm0, %v311_v2  ;;  %v313_v1 = vmax.f32 %v281_v3, 0.0 }
  0x32   : > { %345 = vst.msk [vmem:[%s665_s8 + $0xf0] sm:$0xff] %vm314_vm0, %v312_v0 }
  0x33   : > { %346 = vst.msk [vmem:[%s665_s8 + $0xf8] sm:$0xff] %vm314_vm0, %v313_v1 }
  0x34   : > { %492 = shalt.err (!%p489_p3)
}
  0x35   : > { %s493_s25 = scalar_lea.hbm %s791_s17, 4096  ;;  %s497_s30 = scalar_lea.hbm %s850_s3, 8192 }
  0x36   : > { %p494_p4 = scmp.ne.s32.totalorder %s791_s17, %s493_s25  ;;  %p498_p9 = scmp.lt.s32.totalorder %s791_s17, %s850_s3 }
  0x37   : > { %p499_p10 = scmp.lt.s32.totalorder %s497_s30, %s493_s25 }
  0x38   : > { %p495_p7 = pnand %p494_p4, %p602_p5 }
  0x39   : > { %p500_p11 = por %p499_p10, %p498_p9 }
  0x3a   : > { %p496_p8 = pneg %p495_p7 }
  0x3c   : > { %p501_p12 = pnand %p500_p11, %p496_p8 }
  0x3e   : > { %504 = shalt.err (!%p501_p12)
}
  0x3f   : > { %s542_s6 = smov 128   ;;  %s543_s7 = smov 8  }
  0x40   : > { %438 = dma.vmem_to_hbm [thread:$0]  (%p602_p5), %s793_s10, 4096, %s791_s17, %s807_s19, %s542_s6, %s542_s6, %s543_s7  }
  0x41 PF: > { %p444_p13 = scmp.ge.s32.totalorder %s539_s15, 2  ;;  %s376_s8 = sand.u32 1, %s527_s12  }
  0x42   : > { %s377_s9 = scalar_lea.sflag [#allocation3], %s376_s8 }
  0x43   : > { %p441_p0 = pnand %p444_p13, %p606_p6 }
  0x45   : > { %p442_p1 = pneg %p441_p0 }
  0x47   : > { %522 = dma.done.wait (%p442_p1), %s377_s9, 4096  }
  0x48   : > { %524 = vsyncadd (%p442_p1), %s377_s9, 4294963200  ;;  %p13_p2 = scmp.ge.s32.totalorder %s589_s18, 4   ;;  %s853_s12 = smov %s531_s13 }
  0x49   : > { %s854_s13 = smov %s535_s14  ;;  %s855_s14 = smov %s600_s21 }
  0x4a   : > { %s856_s15 = smov %s589_s18  ;;  %15 = sbr.rel (!%p13_p2) target bundleno = 3 (0x3), region = 67 }
  0x4f   :  { %382 = vsyncpa [#allocation3], 1 }
  0x50   :  { %384 = vsyncpa [#allocation3 + $0x1], 1 }

// kernel: single_conv_forward.2
= control target key start
LH: loop header
LB: loop body
LE: loop exit
PB: predicated region body
PF: predicated region fallthrough
CT: control target
= control target key end

     0   :  { %s1048_s15 = smov 0   ;;  %s1349_s0 = inlined_call_operand.vmem [shape: bf16[512,36], index: 0, kind: input, shape index: {}]   ;;  %s1350_s1 = inlined_call_operand.vmem [shape: bf16[36,32], index: 1, kind: input, shape index: {}]   ;;  %s1351_s2 = inlined_call_operand.vmem [shape: f32[512,32], index: 2, kind: output, shape index: {0}]   ;;  %s1352_s3 = inlined_call_operand.vmem [shape: f32[2,1,32], index: 3, kind: output, shape index: {1}]   ;;  %s1353_s4 = inlined_call_operand.vmem [shape: f32[2,1,32], index: 4, kind: output, shape index: {2}]  }
   0x1 LB: > { %s1054_s16 = sadd.s32 4294967295, %s1021_s15   ;;  %p881_p0 = scmp.ge.s32.totalorder %s1021_s15, 1  ;;  %s1021_s15 = sphi %s1048_s15, %s15_s15  }
   0x2   : > { %p168_p1 = scmp.lt.s32.totalorder %s1021_s15, 3 }
   0x4   : > { %p169_p2 = pnand %p881_p0, %p168_p1 }
   0x5   : > { %s882_s21 = sshll.u32 (!%p169_p2), %s1054_s16, 5  ;;  %p212_p4 = scmp.lt.s32.totalorder (!%p169_p2), %s1054_s16, 1 }
   0x6   : > { %172 = sbr.rel (%p169_p2) target bundleno = 301 (0x12d), region = 28  ;;  %p201_p3 = scmp.lt.s32.totalorder (!%p169_p2), %s882_s21, 63 }
   0xb   : > { %v996_v0 = vld [vmem:[%s1350_s1 + $0x10] ss:$0 sps:$4 sm:$0x33]   ;;  %vm400_vm0 = vcmask 1041408   ;;  %v997_v1 = vld [vmem:[%s1350_s1 + $0x8] sm:$0xff]   ;;  %v998_v3 = vld [vmem:[%s1350_s1] sm:$0xff]  }
   0xc   : > { %986 = vmatprep.subr.msk.bf16.mxu0 %vm400_vm0, %v996_v0  ;;  %v402_v2 = vsel %vm400_vm0, %v996_v0, 0  ;;  %987 = vmatprep.subr.msk.bf16.mxu1 %vm400_vm0, %v996_v0  ;;  %s1355_s21 = smov (!%p201_p3, %s882_s21), 63  ;;  %vm351_vm1 = vcmask 293888   ;;  %vm565_vm2 = vcmask 261120   ;;  %s1357_s16 = smov (!%p212_p4, %s1054_s16), 1  ;;  %vm667_vm3 = vcmask 253952  }
   0xd   : > { %943 = vmatpush3.bf16.msra.mxu0 %v402_v2  ;;  %983 = vmatpush3.bf16.msra.mxu1 %v402_v2  ;;  %s883_s24 = sshll.u32 %s1355_s21, 2  ;;  %s885_s28 = sshll.u32 %s1355_s21, 3 }
   0xe   : > { %944 = vmatprep.subr.bf16.mxu0 %v997_v1  ;;  %981 = vmatprep.subr.bf16.mxu1 %v997_v1  ;;  %s1074_s27 = scalar_lea.vmem %s1349_s0, %s883_s24  ;;  %s1112_s5 = scalar_lea.vmem %s1351_s2, %s885_s28 }
   0xf   : > { %v999_v4 = vld [vmem:[%s1074_s27] sm:$0xff]   ;;  %v1000_v5 = vld [vmem:[%s1074_s27 + $0x8] sm:$0xff]   ;;  %v1001_v6 = vld [vmem:[%s1074_s27 + $0x10] sm:$0xff]   ;;  %s214_s8 = scalar_lea.vmem %s1352_s3, %s1357_s16  ;;  %s217_s11 = scalar_lea.vmem %s1353_s4, %s1357_s16 }
  0x10   : > { %948 = vmatprep.mubr.msk.bf16.mxu0 %vm351_vm1, %v999_v4  ;;  %v1002_v7 = vld [vmem:[%s1074_s27 + $0x18] sm:$0xff]   ;;  %v1003_v8 = vld [vmem:[%s1074_s27 + $0x20] sm:$0xff]   ;;  %v1008_v10 = vld [vmem:[%s1074_s27 + $0x48] sm:$0xff]  }
  0x11   : > { %945 = vmatpush3.bf16.msra.mxu0 %v997_v1  ;;  %984 = vmatpush3.bf16.msra.mxu1 %v997_v1  ;;  %v1007_v9 = vld [vmem:[%s1074_s27 + $0x40] sm:$0xff]   ;;  %v1009_v11 = vld [vmem:[%s1074_s27 + $0x50] sm:$0xff]   ;;  %v1010_v12 = vld [vmem:[%s1074_s27 + $0x58] sm:$0xff]  }
  0x12   : > { %946 = vmatprep.subr.bf16.mxu0 %v998_v3  ;;  %982 = vmatprep.subr.bf16.mxu1 %v998_v3  ;;  %v1011_v13 = vld [vmem:[%s1074_s27 + $0x60] sm:$0xff]   ;;  %v1004_v14 = vld [vmem:[%s1074_s27 + $0x28] sm:$0xff]   ;;  %v1005_v15 = vld [vmem:[%s1074_s27 + $0x30] sm:$0xff]  }
  0x13   : > { %964 = vmatprep.mubr.msk.bf16.mxu1 %vm351_vm1, %v1007_v9  ;;  %v1012_v16 = vld [vmem:[%s1074_s27 + $0x68] sm:$0xff]   ;;  %v1013_v17 = vld [vmem:[%s1074_s27 + $0x70] sm:$0xff]   ;;  %v1006_v18 = vld [vmem:[%s1074_s27 + $0x38] sm:$0xff]  }
  0x14   : > { %v1014_v19 = vld [vmem:[%s1074_s27 + $0x78] sm:$0xff]  }
  0x15   : > { %947 = vmatpush3.bf16.msra.mxu0 %v998_v3  ;;  %985 = vmatpush3.bf16.msra.mxu1 %v998_v3 }
  0x18   : > { %949 = vmatmul.mubr.msk.bf16.vlgmr.msra.gmra.mxu0 %vm351_vm1, %v1000_v5  ;;  %965 = vmatmul.mubr.msk.bf16.vlgmr.msra.gmra.mxu1 %vm351_vm1, %v1008_v10 }
  0x19   : > { %952 = vmatprep.mubr.msk.bf16.mxu0 %vm351_vm1, %v1001_v6  ;;  %968 = vmatprep.mubr.msk.bf16.mxu1 %vm351_vm1, %v1009_v11 }
  0x20   : > { %953 = vmatmul.mubr.msk.bf16.gmra.mxu0 %vm351_vm1, %v1002_v7  ;;  %969 = vmatmul.mubr.msk.bf16.gmra.mxu1 %vm351_vm1, %v1010_v12 }
  0x21   : > { %956 = vmatprep.mubr.msk.bf16.mxu0 %vm351_vm1, %v1003_v8  ;;  %972 = vmatprep.mubr.msk.bf16.mxu1 %vm351_vm1, %v1011_v13 }
  0x28   : > { %957 = vmatmul.mubr.msk.bf16.gmra.mxu0 %vm351_vm1, %v1004_v14  ;;  %973 = vmatmul.mubr.msk.bf16.gmra.mxu1 %vm351_vm1, %v1012_v16 }
  0x29   : > { %960 = vmatprep.mubr.msk.bf16.mxu0 %vm351_vm1, %v1005_v15  ;;  %976 = vmatprep.mubr.msk.bf16.mxu1 %vm351_vm1, %v1013_v17 }
  0x30   : > { %961 = vmatmul.mubr.msk.bf16.gmra.mxu0 %vm351_vm1, %v1006_v18  ;;  %977 = vmatmul.mubr.msk.bf16.gmra.mxu1 %vm351_vm1, %v1014_v19 }
  0xd8   : > { %v950_v20 = vpop.f32.mrf.mxu0  ;;  %v1120_v25 = vpop.f32.mrf.mxu1 }
  0xd9   : > { %568 = vst.msk [vmem:[%s1112_s5 + $0x10] sm:$0xff] %vm565_vm2, %v950_v20  ;;  %v671_v26 = vmul.f32 %v950_v20, %v950_v20  ;;  %584 = vst.msk [vmem:[%s1112_s5 + $0x90] sm:$0xff] %vm565_vm2, %v1120_v25  ;;  %v601_v33 = vsel %vm565_vm2, %v950_v20, 0.0 }
  0xda   : > { %v438_v21 = vpop.f32.mrf.mxu0  ;;  %v1129_v32 = vpop.f32.mrf.mxu1 }
  0xdb   : > { %566 = vst.msk [vmem:[%s1112_s5] sm:$0xff] %vm565_vm2, %v438_v21  ;;  %v669_v23 = vmul.f32 %v438_v21, %v438_v21  ;;  %v598_v27 = vsel %vm565_vm2, %v438_v21, 0.0  ;;  %582 = vst.msk [vmem:[%s1112_s5 + $0x80] sm:$0xff] %vm565_vm2, %v1129_v32  ;;  %v704_v41 = vsel %vm565_vm2, %v671_v26, 0.0 }
  0xdc   : > { %v951_v22 = vpop.f32.mrf.mxu0  ;;  %v1139_v40 = vpop.f32.mrf.mxu1 }
  0xdd   : > { %569 = vst.msk [vmem:[%s1112_s5 + $0x18] sm:$0xff] %vm565_vm2, %v951_v22  ;;  %v701_v34 = vsel %vm565_vm2, %v669_v23, 0.0  ;;  %v672_v35 = vmul.f32 %v951_v22, %v951_v22  ;;  %v603_v42 = vsel %vm565_vm2, %v951_v22, 0.0  ;;  %585 = vst.msk [vmem:[%s1112_s5 + $0x98] sm:$0xff] %vm565_vm2, %v1139_v40 }
  0xde   : > { %v441_v24 = vpop.f32.mrf.mxu0  ;;  %v1148_v47 = vpop.f32.mrf.mxu1 }
  0xdf   : > { %567 = vst.msk [vmem:[%s1112_s5 + $0x8] sm:$0xff] %vm565_vm2, %v441_v24  ;;  %v599_v28 = vsel %vm565_vm2, %v441_v24, 0.0  ;;  %v670_v29 = vmul.f32 %v441_v24, %v441_v24  ;;  %v706_v48 = vsel %vm565_vm2, %v672_v35, 0.0  ;;  %583 = vst.msk [vmem:[%s1112_s5 + $0x88] sm:$0xff] %vm565_vm2, %v1148_v47 }
  0xe0   : > { %v600_v30 = vadd.f32 %v599_v28, %v598_v27  ;;  %v954_v31 = vpop.f32.mrf.mxu0  ;;  %v1157_v53 = vpop.f32.mrf.mxu1 }
  0xe1   : > { %v702_v36 = vsel %vm565_vm2, %v670_v29, 0.0  ;;  %572 = vst.msk [vmem:[%s1112_s5 + $0x30] sm:$0xff] %vm565_vm2, %v954_v31  ;;  %v675_v54 = vmul.f32 %v954_v31, %v954_v31  ;;  %588 = vst.msk [vmem:[%s1112_s5 + $0xb0] sm:$0xff] %vm565_vm2, %v1157_v53  ;;  %v609_v62 = vsel %vm565_vm2, %v954_v31, 0.0 }
  0xe2   : > { %v602_v37 = vadd.f32 %v601_v33, %v600_v30  ;;  %v703_v38 = vadd.f32 %v702_v36, %v701_v34  ;;  %v454_v39 = vpop.f32.mrf.mxu0  ;;  %v1166_v61 = vpop.f32.mrf.mxu1 }
  0xe3   : > { %570 = vst.msk [vmem:[%s1112_s5 + $0x20] sm:$0xff] %vm565_vm2, %v454_v39  ;;  %v673_v43 = vmul.f32 %v454_v39, %v454_v39  ;;  %v605_v49 = vsel %vm565_vm2, %v454_v39, 0.0  ;;  %586 = vst.msk [vmem:[%s1112_s5 + $0xa0] sm:$0xff] %vm565_vm2, %v1166_v61  ;;  %v712_v5 = vsel %vm565_vm2, %v675_v54, 0.0 }
  0xe4   : > { %v705_v44 = vadd.f32 %v704_v41, %v703_v38  ;;  %v604_v45 = vadd.f32 %v603_v42, %v602_v37  ;;  %v955_v46 = vpop.f32.mrf.mxu0  ;;  %v1175_v4 = vpop.f32.mrf.mxu1 }
  0xe5   : > { %573 = vst.msk [vmem:[%s1112_s5 + $0x38] sm:$0xff] %vm565_vm2, %v955_v46  ;;  %v708_v55 = vsel %vm565_vm2, %v673_v43, 0.0  ;;  %v676_v63 = vmul.f32 %v955_v46, %v955_v46  ;;  %v611_v6 = vsel %vm565_vm2, %v955_v46, 0.0  ;;  %589 = vst.msk [vmem:[%s1112_s5 + $0xb8] sm:$0xff] %vm565_vm2, %v1175_v4 }
  0xe6   : > { %v606_v50 = vadd.f32 %v605_v49, %v604_v45  ;;  %v707_v51 = vadd.f32 %v706_v48, %v705_v44  ;;  %v457_v52 = vpop.f32.mrf.mxu0  ;;  %v1184_v11 = vpop.f32.mrf.mxu1 }
  0xe7   : > { %571 = vst.msk [vmem:[%s1112_s5 + $0x28] sm:$0xff] %vm565_vm2, %v457_v52  ;;  %v607_v56 = vsel %vm565_vm2, %v457_v52, 0.0  ;;  %v674_v57 = vmul.f32 %v457_v52, %v457_v52  ;;  %v714_v12 = vsel %vm565_vm2, %v676_v63, 0.0  ;;  %587 = vst.msk [vmem:[%s1112_s5 + $0xa8] sm:$0xff] %vm565_vm2, %v1184_v11 }
  0xe8   : > { %v709_v58 = vadd.f32 %v708_v55, %v707_v51  ;;  %v608_v59 = vadd.f32 %v607_v56, %v606_v50  ;;  %v958_v60 = vpop.f32.mrf.mxu0  ;;  %v1193_v17 = vpop.f32.mrf.mxu1 }
  0xe9   : > { %v710_v0 = vsel %vm565_vm2, %v674_v57, 0.0  ;;  %576 = vst.msk [vmem:[%s1112_s5 + $0x50] sm:$0xff] %vm565_vm2, %v958_v60  ;;  %v679_v18 = vmul.f32 %v958_v60, %v958_v60  ;;  %592 = vst.msk [vmem:[%s1112_s5 + $0xd0] sm:$0xff] %vm565_vm2, %v1193_v17  ;;  %v617_v27 = vsel %vm565_vm2, %v958_v60, 0.0 }
  0xea   : > { %v610_v1 = vadd.f32 %v609_v62, %v608_v59  ;;  %v711_v2 = vadd.f32 %v710_v0, %v709_v58  ;;  %v470_v3 = vpop.f32.mrf.mxu0  ;;  %v1202_v26 = vpop.f32.mrf.mxu1 }
  0xeb   : > { %574 = vst.msk [vmem:[%s1112_s5 + $0x40] sm:$0xff] %vm565_vm2, %v470_v3  ;;  %v677_v7 = vmul.f32 %v470_v3, %v470_v3  ;;  %v613_v13 = vsel %vm565_vm2, %v470_v3, 0.0  ;;  %590 = vst.msk [vmem:[%s1112_s5 + $0xc0] sm:$0xff] %vm565_vm2, %v1202_v26  ;;  %v720_v35 = vsel %vm565_vm2, %v679_v18, 0.0  ;;  %v685_v3 = vmul.f32 %v1129_v32, %v1129_v32 }
  0xec   : > { %v713_v8 = vadd.f32 %v712_v5, %v711_v2  ;;  %v612_v9 = vadd.f32 %v611_v6, %v610_v1  ;;  %v959_v10 = vpop.f32.mrf.mxu0  ;;  %v1211_v34 = vpop.f32.mrf.mxu1 }
  0xed   : > { %577 = vst.msk [vmem:[%s1112_s5 + $0x58] sm:$0xff] %vm565_vm2, %v959_v10  ;;  %v716_v19 = vsel %vm565_vm2, %v677_v7, 0.0  ;;  %v680_v28 = vmul.f32 %v959_v10, %v959_v10  ;;  %v619_v36 = vsel %vm565_vm2, %v959_v10, 0.0  ;;  %593 = vst.msk [vmem:[%s1112_s5 + $0xd8] sm:$0xff] %vm565_vm2, %v1211_v34  ;;  %v686_v10 = vmul.f32 %v1148_v47, %v1148_v47 }
  0xee   : > { %v614_v14 = vadd.f32 %v613_v13, %v612_v9  ;;  %v715_v15 = vadd.f32 %v714_v12, %v713_v8  ;;  %v473_v16 = vpop.f32.mrf.mxu0  ;;  %v1220_v42 = vpop.f32.mrf.mxu1  ;;  %v629_v9 = vsel %vm565_vm2, %v1129_v32, 0.0  ;;  %v633_v32 = vsel %vm565_vm2, %v1120_v25, 0.0 }
  0xef   : > { %575 = vst.msk [vmem:[%s1112_s5 + $0x48] sm:$0xff] %vm565_vm2, %v473_v16  ;;  %v615_v20 = vsel %vm565_vm2, %v473_v16, 0.0  ;;  %v678_v21 = vmul.f32 %v473_v16, %v473_v16  ;;  %v722_v43 = vsel %vm565_vm2, %v680_v28, 0.0  ;;  %591 = vst.msk [vmem:[%s1112_s5 + $0xc8] sm:$0xff] %vm565_vm2, %v1220_v42  ;;  %v631_v16 = vsel %vm565_vm2, %v1148_v47, 0.0 }
  0xf0   : > { %v717_v22 = vadd.f32 %v716_v19, %v715_v15  ;;  %v616_v23 = vadd.f32 %v615_v20, %v614_v14  ;;  %v962_v24 = vpop.f32.mrf.mxu0  ;;  %v1229_v49 = vpop.f32.mrf.mxu1  ;;  %v687_v14 = vmul.f32 %v1120_v25, %v1120_v25  ;;  %v732_v15 = vsel %vm565_vm2, %v685_v3, 0.0 }
  0xf1   : > { %v718_v29 = vsel %vm565_vm2, %v678_v21, 0.0  ;;  %580 = vst.msk [vmem:[%s1112_s5 + $0x70] sm:$0xff] %vm565_vm2, %v962_v24  ;;  %v683_v50 = vmul.f32 %v962_v24, %v962_v24  ;;  %596 = vst.msk [vmem:[%s1112_s5 + $0xf0] sm:$0xff] %vm565_vm2, %v1229_v49  ;;  %v625_v58 = vsel %vm565_vm2, %v962_v24, 0.0  ;;  %v688_v20 = vmul.f32 %v1139_v40, %v1139_v40 }
  0xf2   : > { %v618_v30 = vadd.f32 %v617_v27, %v616_v23  ;;  %v719_v31 = vadd.f32 %v718_v29, %v717_v22  ;;  %v486_v33 = vpop.f32.mrf.mxu0  ;;  %v1238_v57 = vpop.f32.mrf.mxu1  ;;  %v734_v21 = vsel %vm565_vm2, %v686_v10, 0.0  ;;  %v736_v24 = vsel %vm565_vm2, %v687_v14, 0.0 }
  0xf3   : > { %578 = vst.msk [vmem:[%s1112_s5 + $0x60] sm:$0xff] %vm565_vm2, %v486_v33  ;;  %v681_v37 = vmul.f32 %v486_v33, %v486_v33  ;;  %v621_v44 = vsel %vm565_vm2, %v486_v33, 0.0  ;;  %594 = vst.msk [vmem:[%s1112_s5 + $0xe0] sm:$0xff] %vm565_vm2, %v1238_v57  ;;  %v728_v1 = vsel %vm565_vm2, %v683_v50, 0.0  ;;  %v635_v27 = vsel %vm565_vm2, %v1139_v40, 0.0 }
  0xf4   : > { %v721_v38 = vadd.f32 %v720_v35, %v719_v31  ;;  %v620_v39 = vadd.f32 %v619_v36, %v618_v30  ;;  %v963_v41 = vpop.f32.mrf.mxu0  ;;  %v1245_v0 = vpop.f32.mrf.mxu1  ;;  %v689_v47 = vmul.f32 %v1166_v61, %v1166_v61  ;;  %v738_v30 = vsel %vm565_vm2, %v688_v20, 0.0 }
  0xf5   : > { %581 = vst.msk [vmem:[%s1112_s5 + $0x78] sm:$0xff] %vm565_vm2, %v963_v41  ;;  %v724_v51 = vsel %vm565_vm2, %v681_v37, 0.0  ;;  %v684_v59 = vmul.f32 %v963_v41, %v963_v41  ;;  %v627_v2 = vsel %vm565_vm2, %v963_v41, 0.0  ;;  %597 = vst.msk [vmem:[%s1112_s5 + $0xf8] sm:$0xff] %vm565_vm2, %v1245_v0  ;;  %v637_v25 = vsel %vm565_vm2, %v1166_v61, 0.0 }
  0xf6   : > { %v622_v45 = vadd.f32 %v621_v44, %v620_v39  ;;  %v723_v46 = vadd.f32 %v722_v43, %v721_v38  ;;  %v489_v48 = vpop.f32.mrf.mxu0  ;;  %v1254_v7 = vpop.f32.mrf.mxu1  ;;  %v690_v31 = vmul.f32 %v1184_v11, %v1184_v11  ;;  %v691_v36 = vmul.f32 %v1157_v53, %v1157_v53 }
  0xf7   : > { %579 = vst.msk [vmem:[%s1112_s5 + $0x68] sm:$0xff] %vm565_vm2, %v489_v48  ;;  %v623_v52 = vsel %vm565_vm2, %v489_v48, 0.0  ;;  %v682_v54 = vmul.f32 %v489_v48, %v489_v48  ;;  %v730_v8 = vsel %vm565_vm2, %v684_v59, 0.0  ;;  %595 = vst.msk [vmem:[%s1112_s5 + $0xe8] sm:$0xff] %vm565_vm2, %v1254_v7  ;;  %v740_v40 = vsel %vm565_vm2, %v689_v47, 0.0 }
  0xf8   : > { %v725_v55 = vadd.f32 %v724_v51, %v723_v46  ;;  %v624_v56 = vadd.f32 %v623_v52, %v622_v45  ;;  %v639_v37 = vsel %vm565_vm2, %v1184_v11, 0.0  ;;  %v641_v41 = vsel %vm565_vm2, %v1157_v53, 0.0 }
  0xf9   : > { %v726_v60 = vsel %vm565_vm2, %v682_v54, 0.0  ;;  %v692_v61 = vmul.f32 %v1175_v4, %v1175_v4  ;;  %v742_v43 = vsel %vm565_vm2, %v690_v31, 0.0  ;;  %v744_v46 = vsel %vm565_vm2, %v691_v36, 0.0 }
  0xfa   : > { %v626_v62 = vadd.f32 %v625_v58, %v624_v56  ;;  %v727_v63 = vadd.f32 %v726_v60, %v725_v55  ;;  %v643_v48 = vsel %vm565_vm2, %v1175_v4, 0.0  ;;  %v693_v11 = vmul.f32 %v1202_v26, %v1202_v26 }
  0xfb   : > { %v746_v52 = vsel %vm565_vm2, %v692_v61, 0.0  ;;  %v645_v53 = vsel %vm565_vm2, %v1202_v26, 0.0  ;;  %v694_v54 = vmul.f32 %v1220_v42, %v1220_v42  ;;  %v695_v58 = vmul.f32 %v1193_v17, %v1193_v17 }
  0xfc   : > { %v628_v5 = vadd.f32 %v627_v2, %v626_v62  ;;  %v729_v6 = vadd.f32 %v728_v1, %v727_v63  ;;  %v748_v4 = vsel %vm565_vm2, %v693_v11, 0.0  ;;  %v647_v59 = vsel %vm565_vm2, %v1220_v42, 0.0 }
  0xfd   : > { %v649_v63 = vsel %vm565_vm2, %v1193_v17, 0.0  ;;  %v696_v26 = vmul.f32 %v1211_v34, %v1211_v34  ;;  %v750_v1 = vsel %vm565_vm2, %v694_v54, 0.0  ;;  %v697_v42 = vmul.f32 %v1238_v57, %v1238_v57 }
  0xfe   : > { %v731_v12 = vadd.f32 %v730_v8, %v729_v6  ;;  %v630_v13 = vadd.f32 %v629_v9, %v628_v5  ;;  %v752_v5 = vsel %vm565_vm2, %v695_v58, 0.0  ;;  %v651_v6 = vsel %vm565_vm2, %v1211_v34, 0.0 }
  0xff   : > { %v754_v10 = vsel %vm565_vm2, %v696_v26, 0.0  ;;  %v653_v17 = vsel %vm565_vm2, %v1238_v57, 0.0  ;;  %v756_v34 = vsel %vm565_vm2, %v697_v42, 0.0  ;;  %v700_v57 = vmul.f32 %v1245_v0, %v1245_v0 }
 0x100   : > { %v632_v18 = vadd.f32 %v631_v16, %v630_v13  ;;  %v733_v19 = vadd.f32 %v732_v15, %v731_v12  ;;  %v698_v12 = vmul.f32 %v1254_v7, %v1254_v7  ;;  %v699_v15 = vmul.f32 %v1229_v49, %v1229_v49 }
 0x101   : > { %v655_v16 = vsel %vm565_vm2, %v1254_v7, 0.0  ;;  %v762_v47 = vsel %vm565_vm2, %v700_v57, 0.0 }
 0x102   : > { %v634_v22 = vadd.f32 %v633_v32, %v632_v18  ;;  %v735_v23 = vadd.f32 %v734_v21, %v733_v19  ;;  %v657_v32 = vsel %vm565_vm2, %v1229_v49, 0.0  ;;  %v758_v20 = vsel %vm565_vm2, %v698_v12, 0.0 }
 0x104   : > { %v737_v28 = vadd.f32 %v736_v24, %v735_v23  ;;  %v636_v29 = vadd.f32 %v635_v27, %v634_v22  ;;  %v760_v23 = vsel %vm565_vm2, %v699_v15, 0.0  ;;  %v659_v24 = vsel %vm565_vm2, %v1245_v0, 0.0 }
 0x106   : > { %v638_v33 = vadd.f32 %v637_v25, %v636_v29  ;;  %v739_v35 = vadd.f32 %v738_v30, %v737_v28 }
 0x108   : > { %v741_v38 = vadd.f32 %v740_v40, %v739_v35  ;;  %v640_v39 = vadd.f32 %v639_v37, %v638_v33 }
 0x10a   : > { %v642_v44 = vadd.f32 %v641_v41, %v640_v39  ;;  %v743_v45 = vadd.f32 %v742_v43, %v741_v38 }
 0x10c   : > { %v745_v50 = vadd.f32 %v744_v46, %v743_v45  ;;  %v644_v51 = vadd.f32 %v643_v48, %v642_v44 }
 0x10e   : > { %v646_v55 = vadd.f32 %v645_v53, %v644_v51  ;;  %v747_v56 = vadd.f32 %v746_v52, %v745_v50 }
 0x110   : > { %v749_v60 = vadd.f32 %v748_v4, %v747_v56  ;;  %v648_v62 = vadd.f32 %v647_v59, %v646_v55 }
 0x112   : > { %v650_v2 = vadd.f32 %v649_v63, %v648_v62  ;;  %v751_v3 = vadd.f32 %v750_v1, %v749_v60 }
 0x114   : > { %v753_v8 = vadd.f32 %v752_v5, %v751_v3  ;;  %v652_v9 = vadd.f32 %v651_v6, %v650_v2 }
 0x116   : > { %v654_v13 = vadd.f32 %v653_v17, %v652_v9  ;;  %v755_v14 = vadd.f32 %v754_v10, %v753_v8 }
 0x118   : > { %v757_v18 = vadd.f32 %v756_v34, %v755_v14  ;;  %v656_v19 = vadd.f32 %v655_v16, %v654_v13 }
 0x11a   : > { %v658_v21 = vadd.f32 %v657_v32, %v656_v19  ;;  %v759_v22 = vadd.f32 %v758_v20, %v757_v18 }
 0x11c   : > { %v660_v27 = vadd.f32 %v659_v24, %v658_v21  ;;  %v761_v7 = vadd.f32 %v760_v23, %v759_v22 }
 0x11e   : > { %v661_v28 = vrot.slane %v660_v27, 4  ;;  %v763_v29 = vadd.f32 %v762_v47, %v761_v7 }
 0x120   : > { %v662_v49 = vadd.f32 %v661_v28, %v660_v27  ;;  %v764_v30 = vrot.slane %v763_v29, 4 }
 0x122   : > { %v663_v25 = vrot.slane %v662_v49, 2  ;;  %v765_v31 = vadd.f32 %v764_v30, %v763_v29 }
 0x124   : > { %v664_v33 = vadd.f32 %v663_v25, %v662_v49  ;;  %v766_v35 = vrot.slane %v765_v31, 2 }
 0x126   : > { %v665_v36 = vrot.slane %v664_v33, 1  ;;  %v767_v40 = vadd.f32 %v766_v35, %v765_v31 }
 0x128   : > { %v666_v0 = vadd.f32 %v665_v36, %v664_v33  ;;  %v768_v37 = vrot.slane %v767_v40, 1 }
 0x12a   : > { %668 = vst.msk [vmem:[%s214_s8] sm:$0x1] %vm667_vm3, %v666_v0  ;;  %v769_v38 = vadd.f32 %v768_v37, %v767_v40 }
 0x12c   : > { %770 = vst.msk [vmem:[%s217_s11] sm:$0x1] %vm667_vm3, %v769_v38 }
 0x12d PF: > { %s15_s15 = sadd.s32 1, %s1021_s15  }
 0x12e   : > { %p12_p5 = scmp.ge.s32.totalorder %s15_s15, 4  }
 0x130   :  { %14 = sbr.rel (!%p12_p5) target bundleno = 1 (0x1), region = 82 }

</bundles_post_ra>
